<compile_context>
chip_gen: v7x
topology: tpu7x:2x2x1
jax: 0.10.0
libtpu: 0.0.40
codegen_flags: <defaults>
</compile_context>

<pallas_src>
import jax
import jax.numpy as jnp
from jax import lax
from jax.experimental import pallas as pl
from jax.experimental.pallas import tpu as pltpu


def _leaky_relu(x, slope=0.01):
    # nn.LeakyReLU default negative_slope = 0.01
    return jnp.where(x > 0, x, slope * x)


def _round_up(x, m):
    return (x + m - 1) // m * m


def ann_att_kernel(x_ref,    # (tile_b, in_dim)    f32
                   wf_ref,   # (in_dim, 2*hidden)  bf16  [layer1 W | w1]
                   bf_ref,   # (1, 2*hidden)       f32   [layer1 b | 0]
                   w3_ref,   # (hidden, hidden)    bf16
                   b3_ref,   # (1, hidden)         f32
                   w2t_ref,  # (out_dim, hidden)   bf16  (layer2 W, transposed)
                   b2t_ref,  # (out_dim, 1)        f32
                   o_ref):   # (out_dim, tile_b)   f32   (transposed output)
    hidden = w3_ref.shape[0]

    # bf16 cast on the VPU (x arrives as f32 from HBM — single read).
    x = x_ref[...].astype(jnp.bfloat16)

    # Fused layer1 + attention projection: one lane-dense (N = 2*hidden = 128)
    # MXU pass, reading x from VMEM once.
    fused = jnp.dot(x, wf_ref[...],
                    preferred_element_type=jnp.float32) + bf_ref[...]

    line_out = _leaky_relu(fused[:, :hidden])   # LeakyReLU(layer1(x))
    att_1 = jnp.tanh(fused[:, hidden:])         # tanh(x @ w1)
    out1 = line_out * jnp.abs(att_1)

    out2 = _leaky_relu(
        jnp.dot(out1.astype(jnp.bfloat16), w3_ref[...],
                preferred_element_type=jnp.float32) + b3_ref[...])

    # Final projection computed transposed so the stored block is lane-dense:
    # out_t[o, b] = sum_h w2t[o, h] * out2[b, h]   -> (out_dim, tile_b).
    # TODO(synk): if profiling shows the MXU-push slot binding on v6e/v7x,
    # move this K=64 -> N=8 projection onto the VPU (8 broadcast MACs).
    out_t = lax.dot_general(
        w2t_ref[...], out2.astype(jnp.bfloat16),
        dimension_numbers=(((1,), (1,)), ((), ())),
        preferred_element_type=jnp.float32)

    o_ref[...] = (out_t + b2t_ref[...]).astype(o_ref.dtype)


def prepare_params(p):
    """One-time parameter prep (hoisted out of the per-call wrapper)."""
    hidden = p["w3l"].shape[0]
    wf = jnp.concatenate([p["w1l"], p["wa1"]], axis=1).astype(jnp.bfloat16)
    bf = jnp.concatenate([p["b1l"], jnp.zeros((1, hidden), jnp.float32)], axis=1)
    return {
        "wf": wf,                                   # (in_dim, 2*hidden) bf16
        "bf": bf,                                   # (1, 2*hidden)      f32
        "w3": p["w3l"].astype(jnp.bfloat16),        # (hidden, hidden)   bf16
        "b3": p["b3l"],                             # (1, hidden)        f32
        "w2t": p["w2l"].T.astype(jnp.bfloat16),     # (out_dim, hidden)  bf16
        "b2t": p["b2l"].T,                          # (out_dim, 1)       f32
    }


def ann_att_forward(x, prepared, *, tile_b=2048):
    """x: [B, in_dim] f32. prepared: output of prepare_params()."""
    B, in_dim = x.shape
    hidden = prepared["w3"].shape[0]
    out_dim = prepared["w2t"].shape[0]

    tile_b = max(128, (tile_b // 128) * 128)

    # Tiny batches: pad to a single full 128-row tile (cheap).  Large batches
    # are NOT padded — the ragged last block is masked by Pallas.
    if B < 128:
        x = jnp.pad(x, ((0, 128 - B), (0, 0)))
    B_run = x.shape[0]

    # Keep >= 2 grid steps whenever possible so the "parallel" batch axis can
    # shard across both TensorCores on v7x; cap at tile_b.
    tile_eff = min(tile_b, _round_up(pl.cdiv(B_run, 2), 128))
    grid = (pl.cdiv(B_run, tile_eff),)

    wf, bf = prepared["wf"], prepared["bf"]
    w3, b3 = prepared["w3"], prepared["b3"]
    w2t, b2t = prepared["w2t"], prepared["b2t"]

    const = lambda shape: pl.BlockSpec(shape, lambda i: (0, 0))

    flops = 2 * B_run * (in_dim * 2 * hidden + hidden * hidden + hidden * out_dim)
    bytes_accessed = (
        x.size * 4 + out_dim * B_run * 4
        + (wf.size + w3.size + w2t.size) * 2
        + (bf.size + b3.size + b2t.size) * 4)

    # TODO(synk): on v5e/v6e a further win is repacking x to [B/4, 128] in the
    # wrapper (free contiguous reshape) and un-packing to (tile_b, 32) on the
    # in-kernel XLU; left out pending relayout-lowering validation.
    out_t = pl.pallas_call(
        ann_att_kernel,
        out_shape=jax.ShapeDtypeStruct((out_dim, B_run), jnp.float32),
        grid_spec=pl.GridSpec(
            grid=grid,
            in_specs=[
                pl.BlockSpec((tile_eff, in_dim), lambda i: (i, 0)),   # x tile
                const((in_dim, 2 * hidden)), const((1, 2 * hidden)),
                const((hidden, hidden)), const((1, hidden)),
                const((out_dim, hidden)), const((out_dim, 1)),
            ],
            out_specs=pl.BlockSpec((out_dim, tile_eff), lambda i: (0, i)),
        ),
        compiler_params=pltpu.CompilerParams(
            dimension_semantics=("parallel",)),
        cost_estimate=pl.CostEstimate(
            flops=flops,
            transcendentals=B_run * hidden,
            bytes_accessed=bytes_accessed),
    )(x, wf, bf, w3, b3, w2t, b2t)

    # Undo the transposed, lane-dense layout (tiny: 32 B/row).
    return out_t[:, :B].T


def init_params(key, in_dim, hidden_dim, out_dim):
    ks = jax.random.split(key, 8)
    # Linear weights stored as [in_features, out_features] (pre-transposed).
    # The module's w2/b1/b2 parameters never affect the output -> not made.
    return {
        "w1l": jax.random.normal(ks[0], (in_dim, hidden_dim), jnp.float32) * 0.1,
        "b1l": jax.random.normal(ks[1], (1, hidden_dim), jnp.float32) * 0.1,
        "w3l": jax.random.normal(ks[2], (hidden_dim, hidden_dim), jnp.float32) * 0.1,
        "b3l": jax.random.normal(ks[3], (1, hidden_dim), jnp.float32) * 0.1,
        "w2l": jax.random.normal(ks[4], (hidden_dim, out_dim), jnp.float32) * 0.1,
        "b2l": jax.random.normal(ks[5], (1, out_dim), jnp.float32) * 0.1,
        "wa1": jax.random.normal(ks[6], (in_dim, hidden_dim), jnp.float32),
    }


def reference_forward_f32(x, p):
    # Pure-f32 JAX reference of the PyTorch forward (Dropout / att_2 are no-ops).
    line_out = _leaky_relu(x @ p["w1l"] + p["b1l"])
    att_1 = jnp.tanh(x @ p["wa1"])
    out1 = line_out * jnp.abs(att_1)
    out2 = _leaky_relu(out1 @ p["w3l"] + p["b3l"])
    return out2 @ p["w2l"] + p["b2l"]


def reference_forward_bf16(x, p):
    # Mirrors the kernel's numeric policy: bf16 MXU operands, f32 accumulate.
    dot = lambda a, b: jnp.dot(a.astype(jnp.bfloat16), b.astype(jnp.bfloat16),
                               preferred_element_type=jnp.float32)
    line_out = _leaky_relu(dot(x, p["w1l"]) + p["b1l"])
    att_1 = jnp.tanh(dot(x, p["wa1"]))
    out1 = line_out * jnp.abs(att_1)
    out2 = _leaky_relu(dot(out1, p["w3l"]) + p["b3l"])
    return dot(out2, p["w2l"]) + p["b2l"]


if __name__ == "__main__":
    B, in_dim, hidden_dim, out_dim = 8, 32, 64, 8

    key = jax.random.PRNGKey(0)
    kx, kx2, kp = jax.random.split(key, 3)
    params = init_params(kp, in_dim, hidden_dim, out_dim)
    prepared = prepare_params(params)          # one-time param prep

    # Case 1: tiny batch (single 128-row tile, no raggedness).
    x = jax.random.normal(kx, (B, in_dim), jnp.float32)
    out = jax.block_until_ready(ann_att_forward(x, prepared))
    assert out.shape == (B, out_dim)
    assert jnp.allclose(out, reference_forward_bf16(x, params),
                        atol=2e-3, rtol=2e-3), "mismatch vs bf16 reference"
    assert jnp.allclose(out, reference_forward_f32(x, params),
                        atol=1e-1, rtol=1e-1), "mismatch vs f32 reference"

    # Case 2: ragged batch exercising 2 grid steps + masked boundary block.
    B2 = 300
    x2 = jax.random.normal(kx2, (B2, in_dim), jnp.float32)
    out2 = jax.block_until_ready(ann_att_forward(x2, prepared, tile_b=256))
    assert out2.shape == (B2, out_dim)
    assert jnp.allclose(out2, reference_forward_bf16(x2, params),
                        atol=2e-3, rtol=2e-3), "mismatch vs bf16 reference (grid)"
    assert jnp.allclose(out2, reference_forward_f32(x2, params),
                        atol=1e-1, rtol=1e-1), "mismatch vs f32 reference (grid)"

    print("KERNEL_OK")
</pallas_src>

<mosaic_0001>
module attributes {stable_mosaic.version = 11 : i64} {
  func.func @ann_att_kernel(%arg0: i32, %arg1: memref<128x32xf32, #tpu.memory_space<vmem>>, %arg2: memref<32x128xbf16, #tpu.memory_space<vmem>>, %arg3: memref<1x128xf32, #tpu.memory_space<vmem>>, %arg4: memref<64x64xbf16, #tpu.memory_space<vmem>>, %arg5: memref<1x64xf32, #tpu.memory_space<vmem>>, %arg6: memref<8x64xbf16, #tpu.memory_space<vmem>>, %arg7: memref<8x1xf32, #tpu.memory_space<vmem>>, %arg8: memref<8x128xf32, #tpu.memory_space<vmem>>) attributes {dimension_semantics = [#tpu.dimension_semantics<parallel>], iteration_bounds = array<i64: 1>, scalar_prefetch = 0 : i64, scratch_operands = 0 : i64, tpu.core_type = #tpu.core_type<tc>, window_params = [{transform_indices = @transform_0, window_bounds = array<i64: 128, 32>}, {pipeline_mode = #tpu.pipeline_mode<synchronous>, transform_indices = @transform_1, window_bounds = array<i64: 32, 128>}, {pipeline_mode = #tpu.pipeline_mode<synchronous>, transform_indices = @transform_2, window_bounds = array<i64: 1, 128>}, {pipeline_mode = #tpu.pipeline_mode<synchronous>, transform_indices = @transform_3, window_bounds = array<i64: 64, 64>}, {pipeline_mode = #tpu.pipeline_mode<synchronous>, transform_indices = @transform_4, window_bounds = array<i64: 1, 64>}, {pipeline_mode = #tpu.pipeline_mode<synchronous>, transform_indices = @transform_5, window_bounds = array<i64: 8, 64>}, {pipeline_mode = #tpu.pipeline_mode<synchronous>, transform_indices = @transform_6, window_bounds = array<i64: 8, 1>}, {transform_indices = @transform_7, window_bounds = array<i64: 8, 128>}]} {
    %c0 = arith.constant 0 : index
    %c0_0 = arith.constant 0 : index
    %0 = vector.load %arg1[%c0, %c0_0] : memref<128x32xf32, #tpu.memory_space<vmem>>, vector<128x32xf32>
    %1 = arith.truncf %0 : vector<128x32xf32> to vector<128x32xbf16>
    %c0_1 = arith.constant 0 : index
    %c0_2 = arith.constant 0 : index
    %2 = vector.load %arg2[%c0_1, %c0_2] : memref<32x128xbf16, #tpu.memory_space<vmem>>, vector<32x128xbf16>
    %cst = arith.constant dense<0.000000e+00> : vector<128x128xf32>
    %3 = tpu.matmul %1, %2, %cst {dimension_numbers = #tpu.dot_dimension_numbers<[1], [0], [0], [1], [0, 0, 1, 1], [], []>} : vector<128x32xbf16>, vector<32x128xbf16>, vector<128x128xf32> -> vector<128x128xf32>
    %c0_3 = arith.constant 0 : index
    %c0_4 = arith.constant 0 : index
    %4 = vector.load %arg3[%c0_3, %c0_4] : memref<1x128xf32, #tpu.memory_space<vmem>>, vector<1x128xf32>
    %5 = vector.broadcast %4 : vector<1x128xf32> to vector<128x128xf32>
    %6 = arith.addf %3, %5 : vector<128x128xf32>
    %7 = vector.extract_strided_slice %6 {offsets = [0, 0], sizes = [128, 64], strides = [1, 1]} : vector<128x128xf32> to vector<128x64xf32>
    %cst_5 = arith.constant 0.000000e+00 : f32
    %8 = vector.broadcast %cst_5 : f32 to vector<128x64xf32>
    %9 = arith.cmpf ogt, %7, %8 : vector<128x64xf32>
    %cst_6 = arith.constant 0.00999999977 : f32
    %10 = vector.broadcast %cst_6 : f32 to vector<128x64xf32>
    %11 = arith.mulf %10, %7 : vector<128x64xf32>
    %12 = arith.select %9, %7, %11 : vector<128x64xi1>, vector<128x64xf32>
    %13 = vector.extract_strided_slice %6 {offsets = [0, 64], sizes = [128, 64], strides = [1, 1]} : vector<128x128xf32> to vector<128x64xf32>
    %14 = math.tanh %13 : vector<128x64xf32>
    %15 = math.absf %14 : vector<128x64xf32>
    %16 = arith.mulf %12, %15 : vector<128x64xf32>
    %17 = arith.truncf %16 : vector<128x64xf32> to vector<128x64xbf16>
    %c0_7 = arith.constant 0 : index
    %c0_8 = arith.constant 0 : index
    %18 = vector.load %arg4[%c0_7, %c0_8] : memref<64x64xbf16, #tpu.memory_space<vmem>>, vector<64x64xbf16>
    %cst_9 = arith.constant dense<0.000000e+00> : vector<128x64xf32>
    %19 = tpu.matmul %17, %18, %cst_9 {dimension_numbers = #tpu.dot_dimension_numbers<[1], [0], [0], [1], [0, 0, 1, 1], [], []>} : vector<128x64xbf16>, vector<64x64xbf16>, vector<128x64xf32> -> vector<128x64xf32>
    %c0_10 = arith.constant 0 : index
    %c0_11 = arith.constant 0 : index
    %20 = vector.load %arg5[%c0_10, %c0_11] : memref<1x64xf32, #tpu.memory_space<vmem>>, vector<1x64xf32>
    %21 = vector.broadcast %20 : vector<1x64xf32> to vector<128x64xf32>
    %22 = arith.addf %19, %21 : vector<128x64xf32>
    %cst_12 = arith.constant 0.000000e+00 : f32
    %23 = vector.broadcast %cst_12 : f32 to vector<128x64xf32>
    %24 = arith.cmpf ogt, %22, %23 : vector<128x64xf32>
    %cst_13 = arith.constant 0.00999999977 : f32
    %25 = vector.broadcast %cst_13 : f32 to vector<128x64xf32>
    %26 = arith.mulf %25, %22 : vector<128x64xf32>
    %27 = arith.select %24, %22, %26 : vector<128x64xi1>, vector<128x64xf32>
    %c0_14 = arith.constant 0 : index
    %c0_15 = arith.constant 0 : index
    %28 = vector.load %arg6[%c0_14, %c0_15] : memref<8x64xbf16, #tpu.memory_space<vmem>>, vector<8x64xbf16>
    %29 = arith.truncf %27 : vector<128x64xf32> to vector<128x64xbf16>
    %cst_16 = arith.constant dense<0.000000e+00> : vector<8x128xf32>
    %30 = tpu.matmul %28, %29, %cst_16 {dimension_numbers = #tpu.dot_dimension_numbers<[1], [1], [0], [0], [0, 0, 1, 0], [], []>} : vector<8x64xbf16>, vector<128x64xbf16>, vector<8x128xf32> -> vector<8x128xf32>
    %c0_17 = arith.constant 0 : index
    %c0_18 = arith.constant 0 : index
    %31 = vector.load %arg7[%c0_17, %c0_18] : memref<8x1xf32, #tpu.memory_space<vmem>>, vector<8x1xf32>
    %32 = vector.broadcast %31 : vector<8x1xf32> to vector<8x128xf32>
    %33 = arith.addf %30, %32 : vector<8x128xf32>
    %c0_19 = arith.constant 0 : index
    %c0_20 = arith.constant 0 : index
    %34 = vector.load %arg8[%c0_19, %c0_20] : memref<8x128xf32, #tpu.memory_space<vmem>>, vector<8x128xf32>
    tpu.vector_store %arg8[%c0_19, %c0_20], %33 {strides = array<i32>} : memref<8x128xf32, #tpu.memory_space<vmem>>, vector<8x128xf32>,
    return
  }
  func.func @transform_0(%arg0: i32) -> (i32, i32) {
    %c0_i32 = arith.constant 0 : i32
    %c0_i32_0 = arith.constant 0 : i32
    return %arg0, %c0_i32 : i32, i32
  }
  func.func @transform_1(%arg0: i32) -> (i32, i32) {
    %c0_i32 = arith.constant 0 : i32
    %c0_i32_0 = arith.constant 0 : i32
    %c0_i32_1 = arith.constant 0 : i32
    return %c0_i32, %c0_i32_0 : i32, i32
  }
  func.func @transform_2(%arg0: i32) -> (i32, i32) {
    %c0_i32 = arith.constant 0 : i32
    %c0_i32_0 = arith.constant 0 : i32
    %c0_i32_1 = arith.constant 0 : i32
    return %c0_i32, %c0_i32_0 : i32, i32
  }
  func.func @transform_3(%arg0: i32) -> (i32, i32) {
    %c0_i32 = arith.constant 0 : i32
    %c0_i32_0 = arith.constant 0 : i32
    %c0_i32_1 = arith.constant 0 : i32
    return %c0_i32, %c0_i32_0 : i32, i32
  }
  func.func @transform_4(%arg0: i32) -> (i32, i32) {
    %c0_i32 = arith.constant 0 : i32
    %c0_i32_0 = arith.constant 0 : i32
    %c0_i32_1 = arith.constant 0 : i32
    return %c0_i32, %c0_i32_0 : i32, i32
  }
  func.func @transform_5(%arg0: i32) -> (i32, i32) {
    %c0_i32 = arith.constant 0 : i32
    %c0_i32_0 = arith.constant 0 : i32
    %c0_i32_1 = arith.constant 0 : i32
    return %c0_i32, %c0_i32_0 : i32, i32
  }
  func.func @transform_6(%arg0: i32) -> (i32, i32) {
    %c0_i32 = arith.constant 0 : i32
    %c0_i32_0 = arith.constant 0 : i32
    %c0_i32_1 = arith.constant 0 : i32
    return %c0_i32, %c0_i32_0 : i32, i32
  }
  func.func @transform_7(%arg0: i32) -> (i32, i32) {
    %c0_i32 = arith.constant 0 : i32
    %c0_i32_0 = arith.constant 0 : i32
    return %c0_i32, %arg0 : i32, i32
  }
}

</mosaic_0001>

<bundles_post_ra>
// kernel: tpu_custom_call.1
= control target key start
LH: loop header
LB: loop body
LE: loop exit
PB: predicated region body
PF: predicated region fallthrough
CT: control target
= control target key end

     0   :  { %vm75_vm0 = vcmask 261120   ;;  %s1176_s0 = inlined_call_operand.vmem [shape: f32[128,32], index: 0, kind: input, shape index: {}]   ;;  %s1177_s1 = inlined_call_operand.vmem [shape: bf16[32,128], index: 1, kind: input, shape index: {}]   ;;  %s1178_s2 = inlined_call_operand.vmem [shape: f32[1,128], index: 2, kind: input, shape index: {}]   ;;  %s1179_s3 = inlined_call_operand.vmem [shape: bf16[64,64], index: 3, kind: input, shape index: {}]   ;;  %s1180_s4 = inlined_call_operand.vmem [shape: f32[1,64], index: 4, kind: input, shape index: {}]   ;;  %s1181_s5 = inlined_call_operand.vmem [shape: bf16[8,64], index: 5, kind: input, shape index: {}]   ;;  %s1182_s6 = inlined_call_operand.vmem [shape: f32[8,1], index: 6, kind: input, shape index: {}]   ;;  %s1183_s7 = inlined_call_operand.hbm [shape: f32[8,128], index: 7, kind: output, shape index: {}]  }
   0x1   :  { %v797_v0 = vld [vmem:[%s1177_s1] sm:$0xff]   ;;  %v798_v1 = vld [vmem:[%s1177_s1 + $0x8] sm:$0xff]   ;;  %v30_v5 = vld [vmem:[%s1176_s0 + $0x10] sm:$0xff] }
   0x2   :  { %727 = vmatprep.subr.bf16.mxu1 %v797_v0  ;;  %v28_v2 = vld [vmem:[%s1176_s0] sm:$0xff]  ;;  %v29_v3 = vld [vmem:[%s1176_s0 + $0x8] sm:$0xff]  ;;  %v31_v6 = vld [vmem:[%s1176_s0 + $0x18] sm:$0xff] }
   0x3   :  { %728 = vmatpush3.bf16.msra.mxu1 %v797_v0  ;;  %v44_v4 = vpack.c.bf16 %v29_v3, %v28_v2  ;;  %v32_v7 = vld [vmem:[%s1176_s0 + $0x20] sm:$0xff]  ;;  %v33_v8 = vld [vmem:[%s1176_s0 + $0x28] sm:$0xff]  ;;  %v45_v9 = vpack.c.bf16 %v31_v6, %v30_v5 }
   0x4   :  { %729 = vmatprep.subr.bf16.mxu1 %v798_v1  ;;  %v46_v10 = vpack.c.bf16 %v33_v8, %v32_v7 }
   0x5   :  { %731 = vmatprep.mubr.msk.bf16.mxu1 %vm75_vm0, %v44_v4 }
   0x7   :  { %730 = vmatpush3.bf16.msra.mxu1 %v798_v1 }
   0xa   :  { %732 = vmatmul.mubr.msk.bf16.vlgmr.msra.gmra.mrb[0].mxu1 %vm75_vm0, %v45_v9 }
   0xb   :  { %12 = vsyncpa [#allocation3], 0  ;;  %735 = vmatprep.mubr.msk.bf16.mxu1 %vm75_vm0, %v46_v10  ;;  %v34_v11 = vld [vmem:[%s1176_s0 + $0x30] sm:$0xff]  ;;  %v35_v12 = vld [vmem:[%s1176_s0 + $0x38] sm:$0xff]  ;;  %vm404_vm5 = vcmask 523264   ;;  %s863_s24 = smov [#allocation2]  }
   0xc   :  { %v36_v13 = vld [vmem:[%s1176_s0 + $0x40] sm:$0xff]  ;;  %v37_v14 = vld [vmem:[%s1176_s0 + $0x48] sm:$0xff]  ;;  %v47_v15 = vpack.c.bf16 %v35_v12, %v34_v11  ;;  %v38_v17 = vld [vmem:[%s1176_s0 + $0x50] sm:$0xff]  ;;  %s663_s25 = sshll.u32 %s863_s24, 4  ;;  %s664_s25 = int_to_ptr.vmem [resolvable:$true] %s663_s25 }
   0xd   :  { %v48_v16 = vpack.c.bf16 %v37_v14, %v36_v13  ;;  %v39_v18 = vld [vmem:[%s1176_s0 + $0x58] sm:$0xff]  ;;  %v40_v19 = vld [vmem:[%s1176_s0 + $0x60] sm:$0xff]  ;;  %v41_v20 = vld [vmem:[%s1176_s0 + $0x68] sm:$0xff]  ;;  %s835_s26 = scalar_lea.vmem %s664_s25, 128  ;;  %p840_p1 = scmp.lt.s32.totalorder %s664_s25, %s664_s25 }
   0xe   :  { %v49_v21 = vpack.c.bf16 %v39_v18, %v38_v17  ;;  %v50_v22 = vpack.c.bf16 %v41_v20, %v40_v19  ;;  %v42_v23 = vld [vmem:[%s1176_s0 + $0x70] sm:$0xff]  ;;  %v43_v24 = vld [vmem:[%s1176_s0 + $0x78] sm:$0xff]  ;;  %v799_v26 = vld [vmem:[%s1179_s3] sm:$0xff]   ;;  %p836_p0 = scmp.ne.s32.totalorder %s664_s25, %s835_s26  ;;  %p841_p2 = scmp.lt.s32.totalorder %s835_s26, %s835_s26 }
   0xf   :  { %v51_v25 = vpack.c.bf16 %v43_v24, %v42_v23  ;;  %v800_v27 = vld [vmem:[%s1179_s3 + $0x8] sm:$0xff]   ;;  %747 = vmatprep.subr.bf16.mxu1 %v799_v26  ;;  %v801_v28 = vld [vmem:[%s1179_s3 + $0x10] sm:$0xff]   ;;  %v978_v29 = vld [vmem:[%s1178_s2] ss:$0 sm:$0xff] }
  0x10   :  { %748 = vmatpush3.bf16.msra.mxu1 %v799_v26  ;;  %v802_v38 = vld [vmem:[%s1179_s3 + $0x18] sm:$0xff]   ;;  %s859_s3 = smov 64   ;;  %p842_p3 = por %p841_p2, %p840_p1 }
  0x11   :  { %749 = vmatprep.subr.bf16.mxu1 %v800_v27 }
  0x12   :  { %736 = vmatmul.mubr.msk.bf16.gmra.mrb[4].mxu1 %vm75_vm0, %v47_v15  ;;  %p843_p4 = pnand %p842_p3, %p836_p0 }
  0x13   :  { %739 = vmatprep.mubr.msk.bf16.mxu1 %vm75_vm0, %v48_v16 }
  0x14   :  { %750 = vmatpush3.bf16.msra.mxu1 %v800_v27 }
  0x15   :  { %751 = vmatprep.subr.bf16.mxu1 %v801_v28 }
  0x18   :  { %752 = vmatpush3.bf16.msra.mxu1 %v801_v28 }
  0x19   :  { %753 = vmatprep.subr.bf16.mxu1 %v802_v38 }
  0x1a   :  { %740 = vmatmul.mubr.msk.bf16.gmra.mrb[8].mxu1 %vm75_vm0, %v49_v21 }
  0x1b   :  { %743 = vmatprep.mubr.msk.bf16.mxu1 %vm75_vm0, %v50_v22 }
  0x1c   :  { %754 = vmatpush3.bf16.msra.mxu1 %v802_v38 }
  0x22   :  { %744 = vmatmul.mubr.msk.bf16.gmra.mrb[12].mxu1 %vm75_vm0, %v51_v25 }
  0xdd   :  { %v733_v30 = vpop.f32.mrb[0].mxu1 }
  0xde   :  { %v981_v31 = vadd.f32 %v733_v30, %v978_v29  ;;  %v134_v32 = vpop.f32.mrb[1].mxu1 }
  0xdf   :  { %v984_v33 = vadd.f32 %v978_v29, %v134_v32  ;;  %v734_v34 = vpop.f32.mrb[2].mxu1 }
  0xe0   :  { %v987_v35 = vadd.f32 %v734_v34, %v978_v29  ;;  %v137_v36 = vpop.f32.mrb[3].mxu1  ;;  %803 = vtanh.f32 %v981_v31  ;;  %v215_v34 = vmul.f32 0.01, %v981_v31  ;;  %vm199_vm1 = vcmp.gt.f32.partialorder %v981_v31, 0.0 }
  0xe1   :  { %v991_v37 = vadd.f32 %v978_v29, %v137_v36  ;;  %805 = vtanh.f32 %v984_v33  ;;  %vm197_vm3 = vcmp.gt.f32.partialorder %v984_v33, 0.0 }
  0xe2   :  { %807 = vtanh.f32 %v987_v35  ;;  %v216_v36 = vmul.f32 0.01, %v987_v35  ;;  %vm200_vm2 = vcmp.gt.f32.partialorder %v987_v35, 0.0 }
  0xe3   :  { %809 = vtanh.f32 %v991_v37  ;;  %vm198_vm4 = vcmp.gt.f32.partialorder %v991_v37, 0.0 }
  0xe5   :  { %v737_v39 = vpop.f32.mrb[4].mxu1 }
  0xe6   :  { %v1000_v40 = vadd.f32 %v737_v39, %v978_v29  ;;  %v150_v41 = vpop.f32.mrb[5].mxu1  ;;  %v213_v39 = vmul.f32 0.01, %v984_v33 }
  0xe7   :  { %v1003_v42 = vadd.f32 %v978_v29, %v150_v41  ;;  %v738_v43 = vpop.f32.mrb[6].mxu1  ;;  %v214_v41 = vmul.f32 0.01, %v991_v37 }
  0xe8   :  { %v1006_v44 = vadd.f32 %v738_v43, %v978_v29  ;;  %v153_v45 = vpop.f32.mrb[7].mxu1  ;;  %811 = vtanh.f32 %v1000_v40  ;;  %v231_v43 = vsel %vm199_vm1, %v981_v31, %v215_v34  ;;  %vm203_vm8 = vcmp.gt.f32.partialorder %v1000_v40, 0.0 }
  0xe9   :  { %v1010_v46 = vadd.f32 %v978_v29, %v153_v45  ;;  %813 = vtanh.f32 %v1003_v42  ;;  %vm201_vm6 = vcmp.gt.f32.partialorder %v1003_v42, 0.0 }
  0xea   :  { %v804_v47 = vpop.eup %803  ;;  %815 = vtanh.f32 %v1006_v44  ;;  %vm204_vm9 = vcmp.gt.f32.partialorder %v1006_v44, 0.0 }
  0xeb   :  { %v806_v48 = vpop.eup %805  ;;  %v263_v49 = vand.u32 2147483647, %v804_v47  ;;  %817 = vtanh.f32 %v1010_v46  ;;  %v232_v47 = vsel %vm200_vm2, %v987_v35, %v216_v36  ;;  %vm202_vm7 = vcmp.gt.f32.partialorder %v1010_v46, 0.0 }
  0xec   :  { %v808_v50 = vpop.eup %807  ;;  %v261_v51 = vand.u32 2147483647, %v806_v48  ;;  %vm861_vm2 = vmmov 0  }
  0xed   :  { %v810_v52 = vpop.eup %809  ;;  %297 = vrot.lane.b32.xlu1 %v263_v49, %s859_s3  ;;  %v741_v53 = vpop.f32.mrb[8].mxu1  ;;  %v264_v58 = vand.u32 2147483647, %v808_v50  ;;  %v229_v49 = vsel %vm197_vm3, %v984_v33, %v213_v39 }
  0xee   :  { %v1017_v54 = vadd.f32 %v741_v53, %v978_v29  ;;  %v166_v55 = vpop.f32.mrb[9].mxu1  ;;  %293 = vrot.lane.b32.xlu0 %v261_v51, %s859_s3  ;;  %v262_v61 = vand.u32 2147483647, %v810_v52  ;;  %v230_v51 = vsel %vm198_vm4, %v991_v37, %v214_v41 }
  0xef   :  { %v1021_v56 = vadd.f32 %v978_v29, %v166_v55  ;;  %v742_v57 = vpop.f32.mrb[10].mxu1 }
  0xf0   :  { %v1024_v59 = vadd.f32 %v742_v57, %v978_v29  ;;  %v169_v60 = vpop.f32.mrb[11].mxu1  ;;  %819 = vtanh.f32 %v1017_v54  ;;  %vm207_vm12 = vcmp.gt.f32.partialorder %v1017_v54, 0.0 }
  0xf1   :  { %v1028_v62 = vadd.f32 %v978_v29, %v169_v60  ;;  %299 = vrot.lane.b32.xlu1 %v264_v58, %s859_s3  ;;  %821 = vtanh.f32 %v1021_v56  ;;  %v217_v58 = vmul.f32 0.01, %v1003_v42  ;;  %v218_v60 = vmul.f32 0.01, %v1010_v46 }
  0xf2   :  { %v812_v63 = vpop.eup %811  ;;  %295 = vrot.lane.b32.xlu0 %v262_v61, %s859_s3  ;;  %823 = vtanh.f32 %v1024_v59  ;;  %vm205_vm10 = vcmp.gt.f32.partialorder %v1021_v56, 0.0  ;;  %vm208_vm13 = vcmp.gt.f32.partialorder %v1024_v59, 0.0 }
  0xf3   :  { %v814_v0 = vpop.eup %813  ;;  %825 = vtanh.f32 %v1028_v62  ;;  %v267_v8 = vand.u32 2147483647, %v812_v63  ;;  %v233_v33 = vsel %vm201_vm6, %v1003_v42, %v217_v58  ;;  %v234_v37 = vsel %vm202_vm7, %v1010_v46, %v218_v60 }
  0xf4   :  { %v816_v1 = vpop.eup %815  ;;  %v265_v2 = vand.u32 2147483647, %v814_v0  ;;  %v219_v63 = vmul.f32 0.01, %v1000_v40  ;;  %v220_v0 = vmul.f32 0.01, %v1006_v44 }
  0xf5   :  { %v818_v3 = vpop.eup %817  ;;  %v745_v4 = vpop.f32.mrb[12].mxu1  ;;  %v268_v13 = vand.u32 2147483647, %v816_v1  ;;  %v221_v46 = vmul.f32 0.01, %v1021_v56  ;;  %vm206_vm11 = vcmp.gt.f32.partialorder %v1028_v62, 0.0 }
  0xf6   :  { %v1036_v5 = vadd.f32 %v745_v4, %v978_v29  ;;  %v182_v6 = vpop.f32.mrb[13].mxu1  ;;  %301 = vrot.lane.b32.xlu0 %v265_v2, %s859_s3  ;;  %v266_v7 = vand.u32 2147483647, %v818_v3  ;;  %v236_v42 = vsel %vm204_vm9, %v1006_v44, %v220_v0 }
  0xf7   :  { %v1040_v9 = vadd.f32 %v978_v29, %v182_v6  ;;  %v746_v10 = vpop.f32.mrb[14].mxu1  ;;  %v235_v6 = vsel %vm203_vm8, %v1000_v40, %v219_v63 }
  0xf8   :  { %v1043_v11 = vadd.f32 %v746_v10, %v978_v29  ;;  %v185_v12 = vpop.f32.mrb[15].mxu1  ;;  %303 = vrot.lane.b32.xlu1 %v266_v7, %s859_s3  ;;  %827 = vtanh.f32 %v1036_v5  ;;  %vm211_vm0 = vcmp.gt.f32.partialorder %v1036_v5, 0.0 }
  0xf9   :  { %v1048_v14 = vadd.f32 %v978_v29, %v185_v12  ;;  %829 = vtanh.f32 %v1040_v9  ;;  %vm209_vm14 = vcmp.gt.f32.partialorder %v1040_v9, 0.0 }
  0xfa   :  { %v820_v15 = vpop.eup %819  ;;  %305 = vrot.lane.b32.xlu0 %v267_v8, %s859_s3  ;;  %831 = vtanh.f32 %v1043_v11  ;;  %v222_v8 = vmul.f32 0.01, %v1028_v62  ;;  %v228_v34 = vmul.f32 0.01, %v1043_v11  ;;  %vm212_vm1 = vcmp.gt.f32.partialorder %v1043_v11, 0.0 }
  0xfb   :  { %v822_v16 = vpop.eup %821  ;;  %833 = vtanh.f32 %v1048_v14  ;;  %v271_v21 = vand.u32 2147483647, %v820_v15  ;;  %vm210_vm15 = vcmp.gt.f32.partialorder %v1048_v14, 0.0 }
  0xfc   :  { %v824_v17 = vpop.eup %823  ;;  %307 = vrot.lane.b32.xlu1 %v268_v13, %s859_s3  ;;  %v269_v18 = vand.u32 2147483647, %v822_v16  ;;  %v237_v16 = vsel %vm205_vm10, %v1021_v56, %v221_v46  ;;  %v238_v40 = vsel %vm206_vm11, %v1028_v62, %v222_v8 }
  0xfd   :  { %v826_v19 = vpop.eup %825  ;;  %v272_v22 = vand.u32 2147483647, %v824_v17  ;;  %v223_v17 = vmul.f32 0.01, %v1017_v54 }
  0xfe   :  { %309 = vrot.lane.b32.xlu0 %v269_v18, %s859_s3  ;;  %v270_v20 = vand.u32 2147483647, %v826_v19  ;;  %v224_v18 = vmul.f32 0.01, %v1024_v59 }
 0x100   :  { %311 = vrot.lane.b32.xlu1 %v270_v20, %s859_s3  ;;  %v240_v56 = vsel %vm208_vm13, %v1024_v59, %v224_v18 }
 0x102   :  { %v828_v23 = vpop.eup %827  ;;  %313 = vrot.lane.b32.xlu0 %v271_v21, %s859_s3 }
 0x103   :  { %v830_v24 = vpop.eup %829  ;;  %v275_v29 = vand.u32 2147483647, %v828_v23  ;;  %v239_v23 = vsel %vm207_vm12, %v1017_v54, %v223_v17 }
 0x104   :  { %v832_v25 = vpop.eup %831  ;;  %315 = vrot.lane.b32.xlu1 %v272_v22, %s859_s3  ;;  %v273_v26 = vand.u32 2147483647, %v830_v24  ;;  %v225_v24 = vmul.f32 0.01, %v1040_v9 }
 0x105   :  { %v834_v27 = vpop.eup %833  ;;  %v276_v30 = vand.u32 2147483647, %v832_v25  ;;  %v226_v25 = vmul.f32 0.01, %v1048_v14 }
 0x106   :  { %317 = vrot.lane.b32.xlu0 %v273_v26, %s859_s3  ;;  %v274_v28 = vand.u32 2147483647, %v834_v27 }
 0x107   :  { %v242_v54 = vsel %vm210_vm15, %v1048_v14, %v226_v25 }
 0x108   :  { %319 = vrot.lane.b32.xlu1 %v274_v28, %s859_s3 }
 0x10a   :  { %321 = vrot.lane.b32.xlu0 %v275_v29, %s859_s3 }
 0x10c   :  { %323 = vrot.lane.b32.xlu1 %v276_v30, %s859_s3  ;;  %v241_v30 = vsel %vm209_vm14, %v1040_v9, %v225_v24  ;;  %v244_v9 = vsel %vm212_vm1, %v1043_v11, %v228_v34  ;;  %v1127_v11 = vld [vmem:[%s1180_s4] ss:$0 sm:$0xff] }
 0x15f   :  { %v298_v32 = vpop.permute.xlu1 %297 }
 0x160   :  { %v294_v38 = vpop.permute.xlu0 %293  ;;  %v343_v48 = vmul.f32 %v298_v32, %v231_v43  ;;  %v227_v32 = vmul.f32 0.01, %v1036_v5 }
 0x161   :  { %v341_v53 = vmul.f32 %v294_v38, %v229_v49  ;;  %v860_v49 = vmov 0.0  }
 0x162   :  { %v243_v43 = vsel %vm211_vm0, %v1036_v5, %v227_v32  ;;  %771 = vmatprep.subr.bf16.mxu0 %v860_v49  ;;  %787 = vmatprep.mubr.msk.bf16.mxu0 %vm861_vm2, %v860_v49  ;;  %v583_v5 = vld [vmem:[%s1182_s6] sm:$0xff] }
 0x163   :  { %v300_v45 = vpop.permute.xlu1 %299 }
 0x164   :  { %v344_v50 = vmul.f32 %v300_v45, %v232_v47  ;;  %v296_v52 = vpop.permute.xlu0 %295 }
 0x165   :  { %v342_v55 = vmul.f32 %v296_v52, %v230_v51 }
 0x166   :  { %v358_v57 = vpack.c.bf16 %v344_v50, %v343_v48  ;;  %v862_v50 = vmov 0  }
 0x167   :  { %v357_v61 = vpack.c.bf16 %v342_v55, %v341_v53  ;;  %796 = vset.pattern.permute.xlu0 %v862_v50 }
 0x168   :  { %v302_v31 = vpop.permute.xlu0 %301  ;;  %586 = vperm.xlu0 %796, %v583_v5  }
 0x169   :  { %755 = vmatprep.mubr.msk.bf16.mxu1 %vm404_vm5, %v357_v61  ;;  %v345_v1 = vmul.f32 %v302_v31, %v233_v33 }
 0x16a   :  { %v304_v35 = vpop.permute.xlu1 %303  ;;  %756 = vmatmul.mubr.msk.bf16.vlgmr.msra.gmra.mrb[16].mxu1 %vm404_vm5, %v358_v57 }
 0x16b   :  { %v346_v2 = vmul.f32 %v304_v35, %v234_v37 }
 0x16c   :  { %v306_v3 = vpop.permute.xlu0 %305 }
 0x16d   :  { %v359_v4 = vpack.c.bf16 %v346_v2, %v345_v1  ;;  %v347_v10 = vmul.f32 %v306_v3, %v235_v6 }
 0x16e   :  { %v308_v7 = vpop.permute.xlu1 %307 }
 0x16f   :  { %v348_v12 = vmul.f32 %v308_v7, %v236_v42  ;;  %759 = vmatprep.mubr.msk.bf16.mxu1 %vm404_vm5, %v359_v4 }
 0x170   :  { %v310_v13 = vpop.permute.xlu0 %309 }
 0x171   :  { %v360_v15 = vpack.c.bf16 %v348_v12, %v347_v10  ;;  %v349_v19 = vmul.f32 %v310_v13, %v237_v16 }
 0x172   :  { %v312_v44 = vpop.permute.xlu1 %311 }
 0x173   :  { %v350_v20 = vmul.f32 %v312_v44, %v238_v40  ;;  %760 = vmatmul.mubr.msk.bf16.gmra.mrb[20].mxu1 %vm404_vm5, %v360_v15 }
 0x174   :  { %v314_v21 = vpop.permute.xlu0 %313 }
 0x175   :  { %v361_v22 = vpack.c.bf16 %v350_v20, %v349_v19  ;;  %v351_v26 = vmul.f32 %v314_v21, %v239_v23 }
 0x176   :  { %v316_v62 = vpop.permute.xlu1 %315 }
 0x177   :  { %v352_v27 = vmul.f32 %v316_v62, %v240_v56  ;;  %763 = vmatprep.mubr.msk.bf16.mxu1 %vm404_vm5, %v361_v22 }
 0x178   :  { %v318_v28 = vpop.permute.xlu0 %317 }
 0x179   :  { %v362_v29 = vpack.c.bf16 %v352_v27, %v351_v26  ;;  %v353_v36 = vmul.f32 %v318_v28, %v241_v30 }
 0x17a   :  { %v320_v59 = vpop.permute.xlu1 %319 }
 0x17b   :  { %v354_v38 = vmul.f32 %v320_v59, %v242_v54  ;;  %764 = vmatmul.mubr.msk.bf16.gmra.mrb[24].mxu1 %vm404_vm5, %v362_v29 }
 0x17c   :  { %v322_v39 = vpop.permute.xlu0 %321 }
 0x17d   :  { %v363_v41 = vpack.c.bf16 %v354_v38, %v353_v36  ;;  %v355_v45 = vmul.f32 %v322_v39, %v243_v43 }
 0x17e   :  { %v324_v14 = vpop.permute.xlu1 %323 }
 0x17f   :  { %v356_v47 = vmul.f32 %v324_v14, %v244_v9  ;;  %767 = vmatprep.mubr.msk.bf16.mxu1 %vm404_vm5, %v363_v41 }
 0x181   :  { %v364_v48 = vpack.c.bf16 %v356_v47, %v355_v45 }
 0x183   :  { %768 = vmatmul.mubr.msk.bf16.gmra.mrb[28].mxu1 %vm404_vm5, %v364_v48 }
 0x23d   :  { %v757_v51 = vpop.f32.mrb[16].mxu1 }
 0x23e   :  { %v472_v52 = vadd.f32 %v757_v51, %v1127_v11  ;;  %v463_v53 = vpop.f32.mrb[17].mxu1 }
 0x23f   :  { %v464_v55 = vadd.f32 %v1127_v11, %v463_v53  ;;  %v758_v57 = vpop.f32.mrb[18].mxu1 }
 0x240   :  { %v544_v58 = vmul.f32 0.01, %v472_v52  ;;  %v475_v60 = vadd.f32 %v758_v57, %v1127_v11  ;;  %v466_v61 = vpop.f32.mrb[19].mxu1  ;;  %vm528_vm3 = vcmp.gt.f32.partialorder %v472_v52, 0.0 }
 0x241   :  { %v542_v31 = vmul.f32 0.01, %v464_v55  ;;  %v467_v33 = vadd.f32 %v1127_v11, %v466_v61  ;;  %vm526_vm4 = vcmp.gt.f32.partialorder %v464_v55, 0.0 }
 0x242   :  { %vm529_vm6 = vcmp.gt.f32.partialorder %v475_v60, 0.0  ;;  %v545_v35 = vmul.f32 0.01, %v475_v60  ;;  %v560_v63 = vsel %vm528_vm3, %v472_v52, %v544_v58 }
 0x243   :  { %vm527_vm7 = vcmp.gt.f32.partialorder %v467_v33, 0.0  ;;  %v543_v37 = vmul.f32 0.01, %v467_v33  ;;  %v558_v1 = vsel %vm526_vm4, %v464_v55, %v542_v31 }
 0x244   :  { %v561_v0 = vsel %vm529_vm6, %v475_v60, %v545_v35 }
 0x245   :  { %v559_v2 = vsel %vm527_vm7, %v467_v33, %v543_v37  ;;  %v576_v3 = vpack.c.bf16 %v561_v0, %v560_v63 }
 0x246   :  { %v761_v4 = vpop.f32.mrb[20].mxu1  ;;  %v575_v6 = vpack.c.bf16 %v559_v2, %v558_v1 }
 0x247   :  { %v488_v42 = vadd.f32 %v761_v4, %v1127_v11  ;;  %v479_v7 = vpop.f32.mrb[21].mxu1  ;;  %v596_v27 = vsel %vm404_vm5, %v576_v3, 0  ;;  %v574_v4 = vld [vmem:[%s1181_s5] sm:$0xf] }
 0x248   :  { %v480_v46 = vadd.f32 %v1127_v11, %v479_v7  ;;  %v762_v8 = vpop.f32.mrb[22].mxu1  ;;  %v593_v10 = vsel %vm404_vm5, %v575_v6, 0  ;;  %v587_v6 = vpop.permute.xlu0 %586 }
 0x249   :  { %v548_v12 = vmul.f32 0.01, %v488_v42  ;;  %v491_v13 = vadd.f32 %v762_v8, %v1127_v11  ;;  %v482_v15 = vpop.f32.mrb[23].mxu1  ;;  %772 = vmatpush3.bf16.xpose.msra.mxu0 %v593_v10  ;;  %vm532_vm8 = vcmp.gt.f32.partialorder %v488_v42, 0.0 }
 0x24a   :  { %v546_v16 = vmul.f32 0.01, %v480_v46  ;;  %v483_v40 = vadd.f32 %v1127_v11, %v482_v15  ;;  %773 = vmatprep.subr.bf16.mxu0 %v860_v49  ;;  %vm530_vm9 = vcmp.gt.f32.partialorder %v480_v46, 0.0 }
 0x24b   :  { %vm533_vm10 = vcmp.gt.f32.partialorder %v491_v13, 0.0  ;;  %v549_v44 = vmul.f32 0.01, %v491_v13  ;;  %v564_v18 = vsel %vm532_vm8, %v488_v42, %v548_v12 }
 0x24c   :  { %vm531_vm11 = vcmp.gt.f32.partialorder %v483_v40, 0.0  ;;  %v547_v17 = vmul.f32 0.01, %v483_v40  ;;  %v562_v21 = vsel %vm530_vm9, %v480_v46, %v546_v16 }
 0x24d   :  { %v565_v19 = vsel %vm533_vm10, %v491_v13, %v549_v44 }
 0x24e   :  { %v765_v20 = vpop.f32.mrb[24].mxu1  ;;  %v563_v22 = vsel %vm531_vm11, %v483_v40, %v547_v17  ;;  %v578_v23 = vpack.c.bf16 %v565_v19, %v564_v18 }
 0x24f   :  { %v504_v56 = vadd.f32 %v765_v20, %v1127_v11  ;;  %v495_v62 = vpop.f32.mrb[25].mxu1  ;;  %v577_v24 = vpack.c.bf16 %v563_v22, %v562_v21 }
 0x250   :  { %v496_v25 = vadd.f32 %v1127_v11, %v495_v62  ;;  %v766_v26 = vpop.f32.mrb[26].mxu1  ;;  %v602_v0 = vsel %vm404_vm5, %v578_v23, 0 }
 0x251   :  { %v552_v28 = vmul.f32 0.01, %v504_v56  ;;  %v507_v29 = vadd.f32 %v766_v26, %v1127_v11  ;;  %v498_v30 = vpop.f32.mrb[27].mxu1  ;;  %774 = vmatpush3.bf16.xpose.msra.mxu0 %v596_v27  ;;  %vm536_vm12 = vcmp.gt.f32.partialorder %v504_v56, 0.0  ;;  %v599_v50 = vsel %vm404_vm5, %v577_v24, 0 }
 0x252   :  { %v550_v54 = vmul.f32 0.01, %v496_v25  ;;  %v499_v59 = vadd.f32 %v1127_v11, %v498_v30  ;;  %775 = vmatprep.subr.bf16.mxu0 %v860_v49  ;;  %vm534_vm13 = vcmp.gt.f32.partialorder %v496_v25, 0.0 }
 0x253   :  { %vm537_vm14 = vcmp.gt.f32.partialorder %v507_v29, 0.0  ;;  %v553_v32 = vmul.f32 0.01, %v507_v29  ;;  %v568_v36 = vsel %vm536_vm12, %v504_v56, %v552_v28 }
 0x254   :  { %vm535_vm15 = vcmp.gt.f32.partialorder %v499_v59, 0.0  ;;  %v551_v34 = vmul.f32 0.01, %v499_v59  ;;  %v566_v41 = vsel %vm534_vm13, %v496_v25, %v550_v54 }
 0x255   :  { %v569_v38 = vsel %vm537_vm14, %v507_v29, %v553_v32 }
 0x256   :  { %v769_v39 = vpop.f32.mrb[28].mxu1  ;;  %v567_v43 = vsel %vm535_vm15, %v499_v59, %v551_v34  ;;  %v580_v9 = vpack.c.bf16 %v569_v38, %v568_v36 }
 0x257   :  { %v520_v14 = vadd.f32 %v769_v39, %v1127_v11  ;;  %v511_v45 = vpop.f32.mrb[29].mxu1  ;;  %v579_v47 = vpack.c.bf16 %v567_v43, %v566_v41 }
 0x258   :  { %v512_v48 = vadd.f32 %v1127_v11, %v511_v45  ;;  %v770_v5 = vpop.f32.mrb[30].mxu1  ;;  %v608_v1 = vsel %vm404_vm5, %v580_v9, 0 }
 0x259   :  { %v556_v51 = vmul.f32 0.01, %v520_v14  ;;  %v523_v52 = vadd.f32 %v770_v5, %v1127_v11  ;;  %v514_v53 = vpop.f32.mrb[31].mxu1  ;;  %776 = vmatpush3.bf16.xpose.msra.mxu0 %v599_v50  ;;  %vm540_vm0 = vcmp.gt.f32.partialorder %v520_v14, 0.0 }
 0x25a   :  { %v554_v55 = vmul.f32 0.01, %v512_v48  ;;  %v515_v57 = vadd.f32 %v1127_v11, %v514_v53  ;;  %777 = vmatprep.subr.bf16.mxu0 %v860_v49  ;;  %vm538_vm1 = vcmp.gt.f32.partialorder %v512_v48, 0.0  ;;  %v605_v11 = vsel %vm404_vm5, %v579_v47, 0 }
 0x25b   :  { %vm541_vm2 = vcmp.gt.f32.partialorder %v523_v52, 0.0  ;;  %v557_v58 = vmul.f32 0.01, %v523_v52  ;;  %v572_v61 = vsel %vm540_vm0, %v520_v14, %v556_v51 }
 0x25c   :  { %vm539_vm3 = vcmp.gt.f32.partialorder %v515_v57, 0.0  ;;  %v555_v60 = vmul.f32 0.01, %v515_v57  ;;  %v570_v33 = vsel %vm538_vm1, %v512_v48, %v554_v55 }
 0x25d   :  { %v573_v31 = vsel %vm541_vm2, %v523_v52, %v557_v58 }
 0x25e   :  { %v571_v35 = vsel %vm539_vm3, %v515_v57, %v555_v60  ;;  %v582_v37 = vpack.c.bf16 %v573_v31, %v572_v61 }
 0x25f   :  { %v581_v63 = vpack.c.bf16 %v571_v35, %v570_v33 }
 0x260   :  { %v614_v3 = vsel %vm404_vm5, %v582_v37, 0 }
 0x261   :  { %778 = vmatpush3.bf16.xpose.msra.mxu0 %v602_v0  ;;  %v611_v2 = vsel %vm404_vm5, %v581_v63, 0 }
 0x262   :  { %779 = vmatprep.subr.bf16.mxu0 %v860_v49 }
 0x269   :  { %780 = vmatpush3.bf16.xpose.msra.mxu0 %v605_v11 }
 0x26a   :  { %781 = vmatprep.subr.bf16.mxu0 %v860_v49 }
 0x271   :  { %782 = vmatpush3.bf16.xpose.msra.mxu0 %v608_v1 }
 0x272   :  { %783 = vmatprep.subr.bf16.mxu0 %v860_v49 }
 0x279   :  { %784 = vmatpush3.bf16.xpose.msra.mxu0 %v611_v2 }
 0x27a   :  { %785 = vmatprep.subr.bf16.mxu0 %v860_v49 }
 0x281   :  { %786 = vmatpush3.bf16.xpose.msra.mxu0 %v614_v3 }
 0x288   :  { %788 = vmatmul.mubr.msk.bf16.vlgmr.msra.gmra.mrb[0].mxu0 %vm404_vm5, %v574_v4 }
 0x35b   :  { %v650_v42 = vpop.f32.mrb[0].mxu0 }
 0x35c   :  { %v651_v7 = vadd.f32 %v650_v42, %v587_v6  ;;  %v789_v46 = vpop.f32.mrb[1].mxu0 }
 0x35d   :  { %v653_v8 = vpop.f32.mrb[2].mxu0 }
 0x35e   :  { %656 = vst [vmem:[#allocation2] sm:$0xff] %v651_v7  ;;  %v790_v10 = vpop.f32.mrb[3].mxu0 }
 0x35f   :  { %846 = shalt.err (!%p843_p4)
}
 0x360   :  { %s847_s28 = scalar_lea.hbm %s1183_s7, 128 }
 0x361   :  { %p848_p5 = scmp.ne.s32.totalorder %s1183_s7, %s847_s28  ;;  %p851_p6 = scmp.lt.u32.totalorder %s847_s28, %s1183_s7 }
 0x363   :  { %p853_p7 = pnand %p851_p6, %p848_p5 }
 0x365   :  { %856 = shalt.err (!%p853_p7)
}
 0x366   :  { %666 = dma.vmem_to_hbm [thread:$0]  %s664_s25, 128, %s1183_s7, [#allocation3]  }
 0x367   :  { %857 = dma.done.wait [#allocation3], 128  }
 0x368   :  { %858 = vsyncadd [#allocation3], 4294967168 }
 0x369   :  { %670 = vsyncpa [#allocation3], 1 }

</bundles_post_ra>
